<compile_context>
chip_gen: v7x
topology: tpu7x:2x2x1
jax: 0.10.0
libtpu: 0.0.40
codegen_flags: <defaults>
</compile_context>

<pallas_src>
import math
from functools import partial

import jax
import jax.numpy as jnp
from jax import lax
from jax.experimental import pallas as pl
from jax.experimental.pallas import tpu as pltpu


# ----------------------------- small helpers ---------------------------------

def _round_up(a, b):
    return (a + b - 1) // b * b


def _cdiv(a, b):
    return -(-a // b)


def _choose_block_m(m, cap=1024, granule=8):
    """Row-tile size: as large as possible (<= cap) while keeping >= 2 grid steps
    whenever the padded row count allows it (v7x has 2 TensorCores and the single
    grid axis is marked "parallel" so it can shard across them)."""
    mp = _round_up(max(m, 1), granule)
    if mp < 2 * granule:
        return mp
    n_steps = max(2, _cdiv(mp, cap))
    return _round_up(_cdiv(mp, n_steps), granule)


def _pad2(a, rows, cols):
    return jnp.pad(a, ((0, rows - a.shape[0]), (0, cols - a.shape[1])))


def _pad_row(v, cols):
    return jnp.pad(v, (0, cols - v.shape[0])).reshape(1, cols)


def _gelu_exact(x):
    # nn.GELU() default = exact erf-based GELU. Kept exact for parity with PyTorch
    # (the tanh approximation would move work to the EUP but changes numerics).
    return 0.5 * x * (1.0 + lax.erf(x * (1.0 / math.sqrt(2.0))))


# ------------------------- fused LN + MLP + residual kernel -------------------

def _ln_mlp_res_kernel(r_ref, g_ref, beta_ref, w1_ref, b1_ref, w2_ref, b2_ref, o_ref,
                       *, d_real, eps, training, dropout_p, seed):
    # r_ref:  (TM, Dp)  residual-stream tile; padded feature columns are exactly zero
    # g/beta: (1, Dp)   LayerNorm affine (zero-padded)
    # w1:(Dp,Hp) b1:(1,Hp) w2:(Hp,Dp) b2:(1,Dp)  zero-padded fc weights/biases
    r = r_ref[...]

    # --- LayerNorm over the real channel dim (padded cols contribute 0 to the sums) ---
    inv_d = 1.0 / float(d_real)
    mean = jnp.sum(r, axis=-1, keepdims=True) * inv_d
    ex2 = jnp.sum(r * r, axis=-1, keepdims=True) * inv_d
    var = jnp.maximum(ex2 - mean * mean, 0.0)
    y = (r - mean) * lax.rsqrt(var + eps) * g_ref[...] + beta_ref[...]

    # --- fc1 (dense 128-lane MXU matmul; no operand casts) ---
    h = jnp.dot(y, w1_ref[...], preferred_element_type=jnp.float32) + b1_ref[...]

    # --- dropout (only traced when training; eval is a no-op like torch.dropout) ---
    if training and dropout_p > 0.0:
        # TODO(synk): on-chip PRNG cannot bit-match torch's RNG stream; same seed ->
        # same mask across calls unless the caller varies `seed` per call.
        pltpu.prng_seed(seed + pl.program_id(0))
        bits = pltpu.prng_random_bits(h.shape)
        if bits.dtype != jnp.uint32:
            bits = pltpu.bitcast(bits, jnp.uint32)
        thresh = jnp.uint32(min(int(round(dropout_p * 4294967296.0)), 4294967295))
        keep = bits >= thresh                       # P(keep) = 1 - dropout_p
        h = jnp.where(keep, h * (1.0 / (1.0 - dropout_p)), 0.0)

    # --- fc2 then GELU (exact, as nn.GELU()), then residual add ---
    z = jnp.dot(h, w2_ref[...], preferred_element_type=jnp.float32) + b2_ref[...]
    z = _gelu_exact(z)
    o_ref[...] = (r + z).astype(o_ref.dtype)


def _ln_mlp_residual(r, gamma, beta, w1, b1, w2, b2, *, d_real, eps=1e-5,
                     training=False, dropout_p=0.5, seed=0, block_m=None):
    """r: (Mp, Dp) padded residual stream.  Returns r + MLP(LN(r)), same shape."""
    Mp, Dp = r.shape
    Hp = w1.shape[1]
    assert Dp % 128 == 0 and Hp % 128 == 0, "pad feature dims to 128 lanes"
    if block_m is None:
        block_m = _choose_block_m(Mp)
    assert Mp % block_m == 0, "pad rows to a multiple of block_m"
    grid = (Mp // block_m,)

    kernel = partial(_ln_mlp_res_kernel, d_real=d_real, eps=eps,
                     training=training, dropout_p=dropout_p, seed=seed)

    nbytes = r.dtype.itemsize
    cost = pl.CostEstimate(
        flops=4 * Mp * Dp * Hp,                       # fc1 + fc2
        transcendentals=Mp * Dp,                      # erf (plus a few rsqrt)
        bytes_accessed=nbytes * (2 * Mp * Dp + 2 * Dp * Hp + Hp + 3 * Dp))

    return pl.pallas_call(
        kernel,
        out_shape=jax.ShapeDtypeStruct((Mp, Dp), r.dtype),
        grid_spec=pltpu.PrefetchScalarGridSpec(
            num_scalar_prefetch=0,
            grid=grid,
            in_specs=[
                pl.BlockSpec((block_m, Dp), lambda i: (i, 0)),   # residual-stream tile
                pl.BlockSpec((1, Dp), lambda i: (0, 0)),         # LN gamma
                pl.BlockSpec((1, Dp), lambda i: (0, 0)),         # LN beta
                pl.BlockSpec((Dp, Hp), lambda i: (0, 0)),        # w1 (resident)
                pl.BlockSpec((1, Hp), lambda i: (0, 0)),         # b1
                pl.BlockSpec((Hp, Dp), lambda i: (0, 0)),        # w2 (resident)
                pl.BlockSpec((1, Dp), lambda i: (0, 0)),         # b2
            ],
            out_specs=pl.BlockSpec((block_m, Dp), lambda i: (i, 0)),
        ),
        compiler_params=pltpu.CompilerParams(
            dimension_semantics=("parallel",),
            vmem_limit_bytes=48 * 1024 * 1024),      # explicit budget, < v7x 64 MiB physical
        cost_estimate=cost,
    )(r, gamma, beta, w1, b1, w2, b2)


# ------------------------------ MlpMixer forward ------------------------------

def mlp_mixer_forward(x, params, *, training=False, dropout_p=0.5, seed=0):
    """x: (bs, tokens, channels).  Returns (bs, channels), matching MlpMixer.forward."""
    bs, tokens, channels = x.shape
    patch_dim = params["blocks"][0]["tok_w1"].shape[0]
    # The PyTorch forward applies the token MLP on the last dim after transpose(0,1),
    # which requires patch_dim == channel_dim for the module to run at all.
    assert patch_dim == channels

    M = bs * tokens
    Dp = _round_up(channels, 128)
    block_m = _choose_block_m(M)
    Mp = _round_up(M, block_m)

    xp = jnp.zeros((Mp, Dp), x.dtype).at[:M, :channels].set(x.reshape(M, channels))

    call_id = 0
    for blk in params["blocks"]:
        g = _pad_row(blk["ln_g"], Dp)
        b = _pad_row(blk["ln_b"], Dp)

        # token-mixing branch (transpose(0,1) pair elided: it is a row permutation)
        Hp_t = _round_up(blk["tok_w1"].shape[1], 128)
        xp = _ln_mlp_residual(
            xp, g, b,
            _pad2(blk["tok_w1"], Dp, Hp_t), _pad_row(blk["tok_b1"], Hp_t),
            _pad2(blk["tok_w2"], Hp_t, Dp), _pad_row(blk["tok_b2"], Dp),
            d_real=channels, training=training, dropout_p=dropout_p,
            seed=(seed + 7919 * call_id) if training else seed, block_m=block_m)
        call_id += 1

        # channel-mixing branch
        Hp_c = _round_up(blk["ch_w1"].shape[1], 128)
        xp = _ln_mlp_residual(
            xp, g, b,
            _pad2(blk["ch_w1"], Dp, Hp_c), _pad_row(blk["ch_b1"], Hp_c),
            _pad2(blk["ch_w2"], Hp_c, Dp), _pad_row(blk["ch_b2"], Dp),
            d_real=channels, training=training, dropout_p=dropout_p,
            seed=(seed + 7919 * call_id) if training else seed, block_m=block_m)
        call_id += 1

    x = xp[:M, :channels].reshape(bs, tokens, channels)

    # final LayerNorm + mean over tokens + global min/max normalization (tiny; plain jnp)
    y = _layer_norm_ref(x, params["ln_g"], params["ln_b"])
    y = y.mean(axis=1)
    return (y - y.min()) / (y.max() - y.min())


# ------------------------------ pure-JAX reference ----------------------------

def _layer_norm_ref(x, g, b, eps=1e-5):
    mu = x.mean(-1, keepdims=True)
    var = ((x - mu) ** 2).mean(-1, keepdims=True)
    return (x - mu) / jnp.sqrt(var + eps) * g + b


def _mlp_block_ref(x, w1, b1, w2, b2):
    h = x @ w1 + b1                 # eval mode: dropout is identity
    return _gelu_exact(h @ w2 + b2)


def mlp_mixer_ref(x, params):
    """Literal transcription of the PyTorch forward (eval mode), transposes included."""
    for blk in params["blocks"]:
        y = _layer_norm_ref(x, blk["ln_g"], blk["ln_b"])
        y = jnp.transpose(y, (1, 0, 2))
        y = _mlp_block_ref(y, blk["tok_w1"], blk["tok_b1"], blk["tok_w2"], blk["tok_b2"])
        y = jnp.transpose(y, (1, 0, 2))
        out = x + y
        y = _layer_norm_ref(out, blk["ln_g"], blk["ln_b"])
        y = _mlp_block_ref(y, blk["ch_w1"], blk["ch_b1"], blk["ch_w2"], blk["ch_b2"])
        x = out + y
    x = _layer_norm_ref(x, params["ln_g"], params["ln_b"])
    x = x.mean(axis=1)
    return (x - x.min()) / (x.max() - x.min())


# ------------------------------ parameter init --------------------------------

def init_mlp_mixer_params(key, patch_dim, channel_dim, num_blocks,
                          token_hidden_dim, channel_hidden_dim):
    def linear(k, fan_in, fan_out):
        kw, kb = jax.random.split(k)
        lim = 1.0 / math.sqrt(fan_in)
        w = jax.random.uniform(kw, (fan_in, fan_out), jnp.float32, -lim, lim)
        b = jax.random.uniform(kb, (fan_out,), jnp.float32, -lim, lim)
        return w, b

    keys = jax.random.split(key, num_blocks + 1)
    blocks = []
    for i in range(num_blocks):
        k1, k2, k3, k4, k5 = jax.random.split(keys[i], 5)
        tok_w1, tok_b1 = linear(k1, patch_dim, token_hidden_dim)
        tok_w2, tok_b2 = linear(k2, token_hidden_dim, patch_dim)
        ch_w1, ch_b1 = linear(k3, channel_dim, channel_hidden_dim)
        ch_w2, ch_b2 = linear(k4, channel_hidden_dim, channel_dim)
        kg, kb = jax.random.split(k5)
        blocks.append(dict(
            ln_g=1.0 + 0.1 * jax.random.normal(kg, (channel_dim,), jnp.float32),
            ln_b=0.1 * jax.random.normal(kb, (channel_dim,), jnp.float32),
            tok_w1=tok_w1, tok_b1=tok_b1, tok_w2=tok_w2, tok_b2=tok_b2,
            ch_w1=ch_w1, ch_b1=ch_b1, ch_w2=ch_w2, ch_b2=ch_b2))
    kg, kb = jax.random.split(keys[num_blocks])
    return dict(
        blocks=blocks,
        ln_g=1.0 + 0.1 * jax.random.normal(kg, (channel_dim,), jnp.float32),
        ln_b=0.1 * jax.random.normal(kb, (channel_dim,), jnp.float32))


# ------------------------------------ main -------------------------------------

if __name__ == "__main__":
    batch, tokens = 2, 8
    patch_dim = channel_dim = 16          # transpose(0,1) in the module requires equality
    token_hidden_dim = channel_hidden_dim = 32
    num_blocks = 2

    key = jax.random.PRNGKey(0)
    kx, kp = jax.random.split(key)
    x = jax.random.normal(kx, (batch, tokens, channel_dim), dtype=jnp.float32)
    params = init_mlp_mixer_params(kp, patch_dim, channel_dim, num_blocks,
                                   token_hidden_dim, channel_hidden_dim)

    out = mlp_mixer_forward(x, params, training=False, dropout_p=0.5)
    jax.block_until_ready(out)

    ref = mlp_mixer_ref(x, params)
    assert out.shape == (batch, channel_dim)
    assert jnp.allclose(out, ref, atol=5e-4, rtol=5e-4), "mismatch vs pure-JAX reference"

    print("KERNEL_OK")
</pallas_src>

<mosaic_0001>
module attributes {stable_mosaic.version = 11 : i64} {
  func.func @_ln_mlp_res_kernel(%arg0: i32, %arg1: memref<8x128xf32, #tpu.memory_space<vmem>>, %arg2: memref<1x128xf32, #tpu.memory_space<vmem>>, %arg3: memref<1x128xf32, #tpu.memory_space<vmem>>, %arg4: memref<128x128xf32, #tpu.memory_space<vmem>>, %arg5: memref<1x128xf32, #tpu.memory_space<vmem>>, %arg6: memref<128x128xf32, #tpu.memory_space<vmem>>, %arg7: memref<1x128xf32, #tpu.memory_space<vmem>>, %arg8: memref<8x128xf32, #tpu.memory_space<vmem>>) attributes {dimension_semantics = [#tpu.dimension_semantics<parallel>], iteration_bounds = array<i64: 2>, scalar_prefetch = 0 : i64, scratch_operands = 0 : i64, tpu.core_type = #tpu.core_type<tc>, window_params = [{transform_indices = @transform_0, window_bounds = array<i64: 8, 128>}, {pipeline_mode = #tpu.pipeline_mode<synchronous>, transform_indices = @transform_1, window_bounds = array<i64: 1, 128>}, {pipeline_mode = #tpu.pipeline_mode<synchronous>, transform_indices = @transform_2, window_bounds = array<i64: 1, 128>}, {pipeline_mode = #tpu.pipeline_mode<synchronous>, transform_indices = @transform_3, window_bounds = array<i64: 128, 128>}, {pipeline_mode = #tpu.pipeline_mode<synchronous>, transform_indices = @transform_4, window_bounds = array<i64: 1, 128>}, {pipeline_mode = #tpu.pipeline_mode<synchronous>, transform_indices = @transform_5, window_bounds = array<i64: 128, 128>}, {pipeline_mode = #tpu.pipeline_mode<synchronous>, transform_indices = @transform_6, window_bounds = array<i64: 1, 128>}, {transform_indices = @transform_7, window_bounds = array<i64: 8, 128>}]} {
    %c0 = arith.constant 0 : index
    %c0_0 = arith.constant 0 : index
    %0 = vector.load %arg1[%c0, %c0_0] : memref<8x128xf32, #tpu.memory_space<vmem>>, vector<8x128xf32>
    %cst = arith.constant dense<0.000000e+00> : vector<8xf32>
    %1 = vector.multi_reduction <add>, %0, %cst [1] : vector<8x128xf32> to vector<8xf32>
    %2 = vector.shape_cast %1 : vector<8xf32> to vector<8x1xf32>
    %cst_1 = arith.constant 6.250000e-02 : f32
    %3 = vector.broadcast %cst_1 : f32 to vector<8x1xf32>
    %4 = arith.mulf %2, %3 : vector<8x1xf32>
    %5 = arith.mulf %0, %0 : vector<8x128xf32>
    %cst_2 = arith.constant dense<0.000000e+00> : vector<8xf32>
    %6 = vector.multi_reduction <add>, %5, %cst_2 [1] : vector<8x128xf32> to vector<8xf32>
    %7 = vector.shape_cast %6 : vector<8xf32> to vector<8x1xf32>
    %cst_3 = arith.constant 6.250000e-02 : f32
    %8 = vector.broadcast %cst_3 : f32 to vector<8x1xf32>
    %9 = arith.mulf %7, %8 : vector<8x1xf32>
    %10 = arith.mulf %4, %4 : vector<8x1xf32>
    %11 = arith.subf %9, %10 : vector<8x1xf32>
    %cst_4 = arith.constant 0.000000e+00 : f32
    %12 = vector.broadcast %cst_4 : f32 to vector<8x1xf32>
    %13 = arith.maximumf %11, %12 : vector<8x1xf32>
    %14 = vector.broadcast %4 : vector<8x1xf32> to vector<8x128xf32>
    %15 = arith.subf %0, %14 : vector<8x128xf32>
    %cst_5 = arith.constant 9.99999974E-6 : f32
    %16 = vector.broadcast %cst_5 : f32 to vector<8x1xf32>
    %17 = arith.addf %13, %16 : vector<8x1xf32>
    %18 = math.rsqrt %17 : vector<8x1xf32>
    %19 = vector.broadcast %18 : vector<8x1xf32> to vector<8x128xf32>
    %20 = arith.mulf %15, %19 : vector<8x128xf32>
    %c0_6 = arith.constant 0 : index
    %c0_7 = arith.constant 0 : index
    %21 = vector.load %arg2[%c0_6, %c0_7] : memref<1x128xf32, #tpu.memory_space<vmem>>, vector<1x128xf32>
    %22 = vector.broadcast %21 : vector<1x128xf32> to vector<8x128xf32>
    %23 = arith.mulf %20, %22 : vector<8x128xf32>
    %c0_8 = arith.constant 0 : index
    %c0_9 = arith.constant 0 : index
    %24 = vector.load %arg3[%c0_8, %c0_9] : memref<1x128xf32, #tpu.memory_space<vmem>>, vector<1x128xf32>
    %25 = vector.broadcast %24 : vector<1x128xf32> to vector<8x128xf32>
    %26 = arith.addf %23, %25 : vector<8x128xf32>
    %c0_10 = arith.constant 0 : index
    %c0_11 = arith.constant 0 : index
    %27 = vector.load %arg4[%c0_10, %c0_11] : memref<128x128xf32, #tpu.memory_space<vmem>>, vector<128x128xf32>
    %cst_12 = arith.constant dense<0.000000e+00> : vector<8x128xf32>
    %28 = tpu.matmul %26, %27, %cst_12 {dimension_numbers = #tpu.dot_dimension_numbers<[1], [0], [0], [1], [0, 0, 1, 1], [], []>} : vector<8x128xf32>, vector<128x128xf32>, vector<8x128xf32> -> vector<8x128xf32>
    %c0_13 = arith.constant 0 : index
    %c0_14 = arith.constant 0 : index
    %29 = vector.load %arg5[%c0_13, %c0_14] : memref<1x128xf32, #tpu.memory_space<vmem>>, vector<1x128xf32>
    %30 = vector.broadcast %29 : vector<1x128xf32> to vector<8x128xf32>
    %31 = arith.addf %28, %30 : vector<8x128xf32>
    %c0_15 = arith.constant 0 : index
    %c0_16 = arith.constant 0 : index
    %32 = vector.load %arg6[%c0_15, %c0_16] : memref<128x128xf32, #tpu.memory_space<vmem>>, vector<128x128xf32>
    %cst_17 = arith.constant dense<0.000000e+00> : vector<8x128xf32>
    %33 = tpu.matmul %31, %32, %cst_17 {dimension_numbers = #tpu.dot_dimension_numbers<[1], [0], [0], [1], [0, 0, 1, 1], [], []>} : vector<8x128xf32>, vector<128x128xf32>, vector<8x128xf32> -> vector<8x128xf32>
    %c0_18 = arith.constant 0 : index
    %c0_19 = arith.constant 0 : index
    %34 = vector.load %arg7[%c0_18, %c0_19] : memref<1x128xf32, #tpu.memory_space<vmem>>, vector<1x128xf32>
    %35 = vector.broadcast %34 : vector<1x128xf32> to vector<8x128xf32>
    %36 = arith.addf %33, %35 : vector<8x128xf32>
    %cst_20 = arith.constant 5.000000e-01 : f32
    %37 = vector.broadcast %cst_20 : f32 to vector<8x128xf32>
    %38 = arith.mulf %37, %36 : vector<8x128xf32>
    %cst_21 = arith.constant 0.707106769 : f32
    %39 = vector.broadcast %cst_21 : f32 to vector<8x128xf32>
    %40 = arith.mulf %36, %39 : vector<8x128xf32>
    %41 = math.erf %40 : vector<8x128xf32>
    %cst_22 = arith.constant 1.000000e+00 : f32
    %42 = vector.broadcast %cst_22 : f32 to vector<8x128xf32>
    %43 = arith.addf %42, %41 : vector<8x128xf32>
    %44 = arith.mulf %38, %43 : vector<8x128xf32>
    %45 = arith.addf %0, %44 : vector<8x128xf32>
    %c0_23 = arith.constant 0 : index
    %c0_24 = arith.constant 0 : index
    %46 = vector.load %arg8[%c0_23, %c0_24] : memref<8x128xf32, #tpu.memory_space<vmem>>, vector<8x128xf32>
    tpu.vector_store %arg8[%c0_23, %c0_24], %45 {strides = array<i32>} : memref<8x128xf32, #tpu.memory_space<vmem>>, vector<8x128xf32>,
    return
  }
  func.func @transform_0(%arg0: i32) -> (i32, i32) {
    %c0_i32 = arith.constant 0 : i32
    %c0_i32_0 = arith.constant 0 : i32
    return %arg0, %c0_i32 : i32, i32
  }
  func.func @transform_1(%arg0: i32) -> (i32, i32) {
    %c0_i32 = arith.constant 0 : i32
    %c0_i32_0 = arith.constant 0 : i32
    %c0_i32_1 = arith.constant 0 : i32
    return %c0_i32, %c0_i32_0 : i32, i32
  }
  func.func @transform_2(%arg0: i32) -> (i32, i32) {
    %c0_i32 = arith.constant 0 : i32
    %c0_i32_0 = arith.constant 0 : i32
    %c0_i32_1 = arith.constant 0 : i32
    return %c0_i32, %c0_i32_0 : i32, i32
  }
  func.func @transform_3(%arg0: i32) -> (i32, i32) {
    %c0_i32 = arith.constant 0 : i32
    %c0_i32_0 = arith.constant 0 : i32
    %c0_i32_1 = arith.constant 0 : i32
    return %c0_i32, %c0_i32_0 : i32, i32
  }
  func.func @transform_4(%arg0: i32) -> (i32, i32) {
    %c0_i32 = arith.constant 0 : i32
    %c0_i32_0 = arith.constant 0 : i32
    %c0_i32_1 = arith.constant 0 : i32
    return %c0_i32, %c0_i32_0 : i32, i32
  }
  func.func @transform_5(%arg0: i32) -> (i32, i32) {
    %c0_i32 = arith.constant 0 : i32
    %c0_i32_0 = arith.constant 0 : i32
    %c0_i32_1 = arith.constant 0 : i32
    return %c0_i32, %c0_i32_0 : i32, i32
  }
  func.func @transform_6(%arg0: i32) -> (i32, i32) {
    %c0_i32 = arith.constant 0 : i32
    %c0_i32_0 = arith.constant 0 : i32
    %c0_i32_1 = arith.constant 0 : i32
    return %c0_i32, %c0_i32_0 : i32, i32
  }
  func.func @transform_7(%arg0: i32) -> (i32, i32) {
    %c0_i32 = arith.constant 0 : i32
    %c0_i32_0 = arith.constant 0 : i32
    return %arg0, %c0_i32 : i32, i32
  }
}

</mosaic_0001>

<bundles_post_ra>
// kernel: tpu_custom_call.1
= control target key start
LH: loop header
LB: loop body
LE: loop exit
PB: predicated region body
PF: predicated region fallthrough
CT: control target
= control target key end

     0   :  { %12 = vsyncpa [#allocation3], 0  ;;  %s1373_s0 = inlined_call_operand.hbm [shape: f32[16,128], index: 0, kind: input, shape index: {}]   ;;  %s1374_s1 = inlined_call_operand.vmem [shape: f32[1,128], index: 1, kind: input, shape index: {}]   ;;  %s1375_s2 = inlined_call_operand.vmem [shape: f32[1,128], index: 2, kind: input, shape index: {}]   ;;  %s1376_s3 = inlined_call_operand.hbm [shape: f32[128,128], index: 3, kind: input, shape index: {}]   ;;  %s1377_s4 = inlined_call_operand.vmem [shape: f32[1,128], index: 4, kind: input, shape index: {}]   ;;  %s1378_s5 = inlined_call_operand.hbm [shape: f32[128,128], index: 5, kind: input, shape index: {}]   ;;  %s1379_s6 = inlined_call_operand.vmem [shape: f32[1,128], index: 6, kind: input, shape index: {}]   ;;  %s1380_s7 = inlined_call_operand.hbm [shape: f32[16,128], index: 7, kind: output, shape index: {}]  }
   0x1   :  { %14 = vsyncpa [#allocation3 + $0x1], 0 }
   0x2   :  { %15 = vsyncpa [#allocation6], 0 }
   0x3   :  { %16 = vsyncpa [#allocation4], 0 }
   0x4   :  { %18 = vsyncpa [#allocation4 + $0x1], 0  ;;  %s1105_s24 = smov 0   ;;  %s1107_s25 = smov 0  }
   0x5   :  { %s1109_s26 = smov 0   ;;  %s1111_s27 = smov 0  }
   0x6 LB: > { %s1126_s28 = sadd.s32 4294967295, %s1054_s27   ;;  %s650_s29 = sadd.s32 4294967294, %s1054_s27   ;;  %s1054_s27 = sphi %s1111_s27, %s1400_s27   ;;  %s1050_s26 = sphi %s1109_s26, %s1399_s26   ;;  %s1046_s25 = sphi %s1107_s25, %s1398_s25   ;;  %s1042_s24 = sphi %s1105_s24, %s1397_s24  }
   0x7   : > { %p44_p0 = scmp.ne.s32.totalorder %s1046_s25, %s1042_s24  ;;  %p1381_p1 = scmp.eq.s32.totalorder %s1126_s28, 0 }
   0x8   : > { %p200_p3 = scmp.eq.s32.totalorder %s650_s29, 1  ;;  %p651_p5 = scmp.ge.s32.totalorder %s1054_s27, 1 }
   0x9   : > { %p1135_p4 = por %p1381_p1, %p44_p0  ;;  %p207_p7 = scmp.lt.s32.totalorder %s1054_s27, 3 }
   0xa   : > { %p1140_p6 = por %p200_p3, %p44_p0  ;;  %s1056_s10 = smov [#allocation5]  }
   0xb   : > { %s1384_s30 = scalar_select %p1135_p4, 1, 0 }
   0xc   : > { %s1385_s8 = scalar_select %p1140_p6, 1, 0 }
   0xd   : > { %p1145_p8 = pnand %p651_p5, %p207_p7  ;;  %s225_s11 = sshll.u32 %s1056_s10, 4  ;;  %s1149_s11 = int_to_ptr.vmem [resolvable:$true] %s225_s11 }
   0xe   : > { %s1057_s13 = smov [#allocation7]   ;;  %s898_s17 = scalar_lea.hbm %s1376_s3, 2048 }
   0xf   : > { %p834_p9 = pneg %p1145_p8  ;;  %s241_s14 = sshll.u32 %s1057_s13, 4  ;;  %s1160_s14 = int_to_ptr.vmem [resolvable:$true] %s241_s14 }
  0x10   : > { %p899_p12 = scmp.ne.s32.totalorder %s1376_s3, %s898_s17  ;;  %p905_p5 = scmp.lt.u32.totalorder %s898_s17, %s1376_s3 }
  0x11   : > { %p1156_p11 = pnand %p834_p9, %p1381_p1 }
  0x13   : > { %p900_p13 = pneg %p1156_p11 }
  0x15   : > { %p901_p0 = pnand %p900_p13, %p899_p12 }
  0x17   : > { %p902_p3 = pneg %p901_p0 }
  0x19   : > { %p907_p7 = pnand %p905_p5, %p902_p3 }
  0x1b   : > { %910 = shalt.err (!%p907_p7)
}
  0x1c   : > { %s911_s22 = scalar_lea.vmem %s1149_s11, 2048  ;;  %p919_p2 = scmp.lt.s32.totalorder %s1149_s11, %s1149_s11 }
  0x1d   : > { %p912_p9 = scmp.ne.s32.totalorder %s1149_s11, %s911_s22  ;;  %p920_p12 = scmp.lt.s32.totalorder %s911_s22, %s911_s22 }
  0x1f   : > { %p914_p10 = pnand %p912_p9, %p900_p13  ;;  %p921_p0 = por %p920_p12, %p919_p2 }
  0x21   : > { %p915_p1 = pneg %p914_p10 }
  0x23   : > { %p922_p6 = pnand %p921_p0, %p915_p1 }
  0x25   : > { %925 = shalt.err (!%p922_p6)
}
  0x26   : > { %s1058_s23 = smov 128   ;;  %s1059_s29 = smov 8  }
  0x27   : > { %837 = dma.hbm_to_vmem [thread:$0]  (!%p1156_p11), %s1376_s3, 2048, %s1149_s11, [#allocation6], %s1058_s23, %s1058_s23, %s1059_s29  }
  0x28   : > { %s926_s17 = scalar_lea.hbm %s1378_s5, 2048 }
  0x29   : > { %p927_p2 = scmp.ne.s32.totalorder %s1378_s5, %s926_s17  ;;  %p933_p10 = scmp.lt.u32.totalorder %s926_s17, %s1378_s5 }
  0x2b   : > { %p929_p1 = pnand %p927_p2, %p900_p13 }
  0x2d   : > { %p930_p6 = pneg %p929_p1 }
  0x2f   : > { %p935_p3 = pnand %p933_p10, %p930_p6 }
  0x31   : > { %938 = shalt.err (!%p935_p3)
}
  0x32   : > { %s939_s11 = scalar_lea.vmem %s1160_s14, 2048  ;;  %p947_p12 = scmp.lt.s32.totalorder %s1160_s14, %s1160_s14 }
  0x33   : > { %p940_p5 = scmp.ne.s32.totalorder %s1160_s14, %s939_s11  ;;  %p948_p0 = scmp.lt.s32.totalorder %s939_s11, %s939_s11 }
  0x35   : > { %p942_p7 = pnand %p940_p5, %p900_p13  ;;  %p949_p2 = por %p948_p0, %p947_p12 }
  0x37   : > { %p943_p9 = pneg %p942_p7 }
  0x39   : > { %p950_p1 = pnand %p949_p2, %p943_p9 }
  0x3b   : > { %953 = shalt.err (!%p950_p1)
}
  0x3c   : > { %840 = dma.hbm_to_vmem [thread:$0]  (!%p1156_p11), %s1378_s5, 2048, %s1160_s14, [#allocation6], %s1058_s23, %s1058_s23, %s1059_s29  }
  0x3d   : > { %s1215_s13 = sadd.s32 1, %s1054_s27   ;;  %s31_s12 = sadd.s32 1, %s1050_s26 }
  0x3e   : > { %s28_s15 = ssub.s32 %s1054_s27, %s1215_s13  ;;  %p38_p13 = scmp.ne.s32.totalorder %s1050_s26, %s1046_s25 }
  0x3f   : > { %p29_p6 = scmp.eq.s32.totalorder %s28_s15, 0  ;;  %p39_p10 = scmp.eq.s32.totalorder %s1054_s27, 0 }
  0x40   : > { %p1388_p3 = scmp.eq.s32.totalorder %s1126_s28, 1  ;;  %p851_p7 = scmp.lt.s32.totalorder %s1054_s27, 2 }
  0x41   : > { %s1231_s17 = scalar_select %p29_p6, %s1050_s26, %s31_s12  }
  0x42   : > { %p1225_p5 = por %p1388_p3, %p38_p13  ;;  %p40_p9 = por %p39_p10, %p38_p13 }
  0x43   : > { %s258_s18 = sand.u32 1, %s1050_s26   ;;  %s656_s14 = sshll.u32 %s1054_s27, 7 }
  0x44   : > { %s1389_s16 = scalar_select %p1225_p5, 1, 0 }
  0x45   : > { %s655_s19 = sshll.u32 %s258_s18, 3  ;;  %s1238_s20 = scalar_lea.hbm %s1373_s0, %s656_s14 }
  0x46   : > { %s262_s21 = scalar_lea.vmem [#allocation2], %s655_s19  ;;  %p1242_p11 = pnand %p851_p7, %p40_p9 }
  0x47   : > { %s269_s11 = sshll.u32 %s262_s21, 4  ;;  %s259_s10 = scalar_lea.sflag [#allocation3], %s258_s18  ;;  %s1240_s11 = int_to_ptr.vmem [resolvable:$true] %s269_s11 }
  0x48   : > { %s954_s12 = scalar_lea.hbm %s1238_s20, 128  ;;  %p956_p0 = pneg %p1242_p11 }
  0x49   : > { %p955_p12 = scmp.ne.s32.totalorder %s1238_s20, %s954_s12  ;;  %s959_s14 = scalar_lea.hbm %s1373_s0, 256 }
  0x4a   : > { %p960_p13 = scmp.lt.u32.totalorder %s1238_s20, %s1373_s0  ;;  %p961_p6 = scmp.lt.u32.totalorder %s959_s14, %s954_s12 }
  0x4b   : > { %p957_p2 = pnand %p956_p0, %p955_p12  ;;  %p963_p3 = scmp.lt.u32.totalorder %s954_s12, %s1238_s20 }
  0x4c   : > { %p962_p10 = por %p961_p6, %p960_p13 }
  0x4d   : > { %p958_p1 = pneg %p957_p2 }
  0x4e   : > { %p964_p7 = por %p963_p3, %p962_p10 }
  0x50   : > { %p965_p9 = pnand %p964_p7, %p958_p1 }
  0x52   : > { %968 = shalt.err (!%p965_p9)
}
  0x53   : > { %s969_s18 = scalar_lea.vmem %s1240_s11, 128  ;;  %s1060_s21 = smov [#allocation2]  }
  0x54   : > { %p970_p12 = scmp.ne.s32.totalorder %s1240_s11, %s969_s18  ;;  %s974_s15 = sshll.u32 %s1060_s21, 4  ;;  %s975_s15 = int_to_ptr.vmem [resolvable:$false] %s974_s15 }
  0x55   : > { %s976_s19 = scalar_lea.vmem %s975_s15, 256  ;;  %p977_p4 = scmp.lt.s32.totalorder %s1240_s11, %s975_s15 }
  0x56   : > { %p972_p2 = pnand %p970_p12, %p956_p0  ;;  %p978_p13 = scmp.lt.s32.totalorder %s976_s19, %s969_s18 }
  0x58   : > { %p973_p5 = pneg %p972_p2  ;;  %p979_p6 = por %p978_p13, %p977_p4 }
  0x5a   : > { %p980_p10 = pnand %p979_p6, %p973_p5 }
  0x5c   : > { %983 = shalt.err (!%p980_p10)
}
  0x5d   : > { %844 = dma.hbm_to_vmem [thread:$0]  (!%p1242_p11), %s1238_s20, 128, %s1240_s11, %s259_s10  }
  0x5e   : > { %278 = sbr.rel (%p1145_p8) target bundleno = 739 (0x2e3), region = 48  ;;  %s1274_s12 = sand.u32 (!%p1145_p8), 1, %s1046_s25  }
  0x5f   : > { %s658_s14 = sshll.u32 (!%p1145_p8), %s1274_s12, 3  ;;  %s281_s23 = scalar_lea.sflag (!%p1145_p8), [#allocation3], %s1274_s12 }
  0x60   : > { %s284_s29 = scalar_lea.vmem (!%p1145_p8), [#allocation2], %s658_s14  ;;  %p1391_p4 = scmp.ne.s32.totalorder (!%p1145_p8), %s1384_s30, 0 }
  0x65   : > { %1029 = dma.done.wait (%p1391_p4), %s281_s23, 128  }
  0x66   : > { %1031 = vsyncadd (%p1391_p4), %s281_s23, 4294967168  ;;  %p1392_p5 = scmp.eq.s32.totalorder %s1126_s28, 0 }
  0x68   : > { %1033 = dma.done.wait (%p1392_p5), [#allocation6], 4096   ;;  %p1393_p8 = pmov %p1392_p5 }
  0x69   : > { %v1061_v0 = vmov 0.0|0.0   ;;  %v1290_v1 = vld [vmem:[%s284_s29] sm:$0xff]  ;;  %v354_v2 = vld [vmem:[#allocation5] sm:$0xff]  ;;  %v355_v3 = vld [vmem:[#allocation5 + $0x8] sm:$0xff]  ;;  %vm1062_vm0 = vmmov 0   ;;  %v1063_v20 = vmov 0.0  }
  0x6a   : > { %1035 = vsyncadd (%p1393_p8), [#allocation6], 4294963200  ;;  %774 = vmatprep.subr.bf16.mxu0 %v1061_v0  ;;  %798 = vmatprep.subr.bf16.mxu1 %v1061_v0  ;;  %v327_v4 = vmul.f32 %v1290_v1, %v1290_v1  ;;  %v775_v5 = vpack.c.bf16 %v355_v3, %v354_v2  ;;  %v356_v6 = vld [vmem:[#allocation5 + $0x10] sm:$0xff]  ;;  %v357_v7 = vld [vmem:[#allocation5 + $0x18] sm:$0xff]  ;;  %s667_s15 = sshll.u32 %s1126_s28, 7  ;;  %s322_s19 = scalar_lea.vmem [#allocation8], %s658_s14 }
  0x6b   : > { %324 = vadd.xlane.f32.xlu0 %v1290_v1  ;;  %v778_v8 = vpack.c.bf16 %v357_v7, %v356_v6  ;;  %v358_v9 = vld [vmem:[#allocation5 + $0x20] sm:$0xff]  ;;  %v359_v10 = vld [vmem:[#allocation5 + $0x28] sm:$0xff]  ;;  %v360_v12 = vld [vmem:[#allocation5 + $0x30] sm:$0xff]  ;;  %736 = vmatprep.mubr.msk.f32.mxu0 %vm1062_vm0, %v1063_v20  ;;  %s561_s23 = sshll.u32 %s322_s19, 4  ;;  %s1329_s9 = scalar_lea.hbm %s1380_s7, %s667_s15  ;;  %s1331_s23 = int_to_ptr.vmem [resolvable:$true] %s561_s23 }
  0x6c   : > { %776 = vmatpush3.bf16.msra.mxu0 %v775_v5  ;;  %v781_v11 = vpack.c.bf16 %v359_v10, %v358_v9  ;;  %v361_v13 = vld [vmem:[#allocation5 + $0x38] sm:$0xff]  ;;  %v362_v15 = vld [vmem:[#allocation5 + $0x40] sm:$0xff]  ;;  %v363_v16 = vld [vmem:[#allocation5 + $0x48] sm:$0xff]  ;;  %771 = vmatprep.mubr.msk.f32.mxu1 %vm1062_vm0, %v1063_v20  ;;  %s548_s20 = scalar_lea.sflag [#allocation4], %s1274_s12  ;;  %s984_s11 = scalar_lea.vmem %s1331_s23, 128 }
  0x6d   : > { %777 = vmatprep.subr.bf16.mxu0 %v1061_v0  ;;  %v784_v14 = vpack.c.bf16 %v361_v13, %v360_v12  ;;  %v787_v17 = vpack.c.bf16 %v363_v16, %v362_v15  ;;  %v364_v18 = vld [vmem:[#allocation5 + $0x50] sm:$0xff]  ;;  %v365_v19 = vld [vmem:[#allocation5 + $0x58] sm:$0xff]  ;;  %v366_v22 = vld [vmem:[#allocation5 + $0x60] sm:$0xff]  ;;  %p985_p11 = scmp.ne.s32.totalorder %s1331_s23, %s984_s11  ;;  %p1394_p0 = scmp.ne.s32.totalorder %s1389_s16, 0 }
  0x6e   : > { %v790_v21 = vpack.c.bf16 %v365_v19, %v364_v18  ;;  %v367_v23 = vld [vmem:[#allocation5 + $0x68] sm:$0xff]  ;;  %v368_v25 = vld [vmem:[#allocation5 + $0x70] sm:$0xff]  ;;  %v369_v26 = vld [vmem:[#allocation5 + $0x78] sm:$0xff]  ;;  %s1064_s28 = smov [#allocation8]  }
  0x6f   : > { %328 = vadd.xlane.f32.xlu0 %v327_v4  ;;  %v793_v24 = vpack.c.bf16 %v367_v23, %v366_v22  ;;  %v796_v27 = vpack.c.bf16 %v369_v26, %v368_v25  ;;  %v447_v28 = vld [vmem:[#allocation7] sm:$0xff]  ;;  %v448_v29 = vld [vmem:[#allocation7 + $0x8] sm:$0xff]  ;;  %v449_v30 = vld [vmem:[#allocation7 + $0x10] sm:$0xff]  ;;  %p986_p1 = pnand %p985_p11, %p1394_p0  ;;  %s988_s14 = sshll.u32 %s1064_s28, 4  ;;  %s989_s14 = int_to_ptr.vmem [resolvable:$false] %s988_s14 }
  0x70   : > { %779 = vmatpush3.bf16.msra.mxu0 %v778_v8  ;;  %v799_v31 = vpack.c.bf16 %v448_v29, %v447_v28  ;;  %v450_v32 = vld [vmem:[#allocation7 + $0x18] sm:$0xff]  ;;  %v451_v34 = vld [vmem:[#allocation7 + $0x20] sm:$0xff]  ;;  %v452_v35 = vld [vmem:[#allocation7 + $0x28] sm:$0xff]  ;;  %s990_s22 = scalar_lea.vmem %s989_s14, 256  ;;  %p991_p7 = scmp.lt.s32.totalorder %s1331_s23, %s989_s14 }
  0x71   : > { %780 = vmatprep.subr.bf16.mxu0 %v1061_v0  ;;  %v802_v33 = vpack.c.bf16 %v450_v32, %v449_v30  ;;  %v805_v36 = vpack.c.bf16 %v452_v35, %v451_v34  ;;  %v453_v37 = vld [vmem:[#allocation7 + $0x30] sm:$0xff]  ;;  %v454_v38 = vld [vmem:[#allocation7 + $0x38] sm:$0xff]  ;;  %v455_v40 = vld [vmem:[#allocation7 + $0x40] sm:$0xff]  ;;  %p987_p3 = pneg %p986_p1  ;;  %p992_p9 = scmp.lt.s32.totalorder %s990_s22, %s984_s11 }
  0x72   : > { %800 = vmatpush3.bf16.msra.mxu1 %v799_v31  ;;  %v808_v39 = vpack.c.bf16 %v454_v38, %v453_v37  ;;  %v456_v41 = vld [vmem:[#allocation7 + $0x48] sm:$0xff]  ;;  %v457_v43 = vld [vmem:[#allocation7 + $0x50] sm:$0xff]  ;;  %v458_v44 = vld [vmem:[#allocation7 + $0x58] sm:$0xff] }
  0x73   : > { %801 = vmatprep.subr.bf16.mxu1 %v1061_v0  ;;  %v811_v42 = vpack.c.bf16 %v456_v41, %v455_v40  ;;  %v814_v45 = vpack.c.bf16 %v458_v44, %v457_v43  ;;  %v459_v46 = vld [vmem:[#allocation7 + $0x60] sm:$0xff]  ;;  %v460_v47 = vld [vmem:[#allocation7 + $0x68] sm:$0xff]  ;;  %v662_v59 = vld [vmem:[%s1374_s1] ss:$0 sm:$0xff]  ;;  %p993_p12 = por %p992_p9, %p991_p7 }
  0x74   : > { %782 = vmatpush3.bf16.msra.mxu0 %v781_v11  ;;  %v817_v48 = vpack.c.bf16 %v460_v47, %v459_v46  ;;  %v663_v61 = vld [vmem:[%s1375_s2] ss:$0 sm:$0xff]  ;;  %v462_v2 = vld [vmem:[#allocation7 + $0x78] sm:$0xff] }
  0x75   : > { %783 = vmatprep.subr.bf16.mxu0 %v1061_v0  ;;  %v664_v4 = vld [vmem:[%s1377_s4] ss:$0 sm:$0xff]  ;;  %p994_p2 = pnand %p993_p12, %p987_p3 }
  0x76   : > { %803 = vmatpush3.bf16.msra.mxu1 %v802_v33  ;;  %v665_v8 = vld [vmem:[%s1379_s6] ss:$0 sm:$0xff] }
  0x77   : > { %804 = vmatprep.subr.bf16.mxu1 %v1061_v0 }
  0x78   : > { %785 = vmatpush3.bf16.msra.mxu0 %v784_v14 }
  0x79   : > { %786 = vmatprep.subr.bf16.mxu0 %v1061_v0 }
  0x7a   : > { %806 = vmatpush3.bf16.msra.mxu1 %v805_v36 }
  0x7b   : > { %807 = vmatprep.subr.bf16.mxu1 %v1061_v0 }
  0x7c   : > { %788 = vmatpush3.bf16.msra.mxu0 %v787_v17 }
  0x7d   : > { %789 = vmatprep.subr.bf16.mxu0 %v1061_v0 }
  0x7e   : > { %809 = vmatpush3.bf16.msra.mxu1 %v808_v39 }
  0x7f   : > { %810 = vmatprep.subr.bf16.mxu1 %v1061_v0 }
  0x80   : > { %791 = vmatpush3.bf16.msra.mxu0 %v790_v21 }
  0x81   : > { %792 = vmatprep.subr.bf16.mxu0 %v1061_v0 }
  0x82   : > { %812 = vmatpush3.bf16.msra.mxu1 %v811_v42 }
  0x83   : > { %813 = vmatprep.subr.bf16.mxu1 %v1061_v0 }
  0x84   : > { %794 = vmatpush3.bf16.msra.mxu0 %v793_v24 }
  0x85   : > { %795 = vmatprep.subr.bf16.mxu0 %v1061_v0 }
  0x86   : > { %815 = vmatpush3.bf16.msra.mxu1 %v814_v45 }
  0x87   : > { %816 = vmatprep.subr.bf16.mxu1 %v1061_v0 }
  0x88   : > { %797 = vmatpush3.bf16.msra.mxu0 %v796_v27 }
  0x8a   : > { %818 = vmatpush3.bf16.msra.mxu1 %v817_v48 }
  0x8b   : > { %819 = vmatprep.subr.bf16.mxu1 %v1061_v0  ;;  %v461_v0 = vld [vmem:[#allocation7 + $0x70] sm:$0xff] }
  0x8c   : > { %v820_v3 = vpack.c.bf16 %v462_v2, %v461_v0 }
  0x8e   : > { %821 = vmatpush3.bf16.msra.mxu1 %v820_v3 }
  0xf8   : > { %v325_v49 = vpop.xlane.xlu0 %324 }
  0xf9   : > { %v326_v50 = vmul.f32 0.0625, %v325_v49 }
  0xfb   : > { %v331_v52 = vmul.f32 %v326_v50, %v326_v50  ;;  %v334_v57 = vsub.f32 %v1290_v1, %v326_v50 }
  0xfc   : > { %v329_v51 = vpop.xlane.xlu0 %328 }
  0xfd   : > { %v330_v53 = vmul.f32 0.0625, %v329_v51 }
  0xff   : > { %v332_v54 = vsub.f32 %v330_v53, %v331_v52 }
 0x101   : > { %v333_v55 = vmax.f32 %v332_v54, 0.0 }
 0x103   : > { %v335_v56 = vadd.f32 1e-05, %v333_v55 }
 0x105   : > { %894 = vrsqrt.f32 %v335_v56 }
 0x10f   : > { %v895_v58 = vpop.eup %894 }
 0x110   : > { %v337_v60 = vmul.f32 %v895_v58, %v334_v57 }
 0x112   : > { %v345_v62 = vmul.f32 %v662_v59, %v337_v60 }
 0x114   : > { %v353_v63 = vadd.f32 %v663_v61, %v345_v62 }
 0x116   : > { %737 = vmatmul.mubr.f32.vlgmr.msra.gmra.mrb[0].mxu0 %v353_v63 }
 0x1e9   : > { %v443_v5 = vpop.f32.mrb[0].mxu0 }
 0x1ea   : > { %v444_v6 = vadd.f32 %v664_v4, %v443_v5  ;;  %v738_v7 = vpop.f32.mrb[1].mxu0 }
 0x1ec   : > { %772 = vmatmul.mubr.f32.vlgmr.msra.gmra.mrb[0].mxu1 %v444_v6 }
 0x2bf   : > { %v536_v9 = vpop.f32.mrb[0].mxu1 }
 0x2c0   : > { %v537_v10 = vadd.f32 %v665_v8, %v536_v9  ;;  %v773_v11 = vpop.f32.mrb[1].mxu1 }
 0x2c2   : > { %v541_v12 = vmul.f32 0.70710677, %v537_v10  ;;  %v540_v14 = vmul.f32 0.5, %v537_v10 }
 0x2c4   : > { %896 = verf.f32 %v541_v12 }
 0x2ce   : > { %v897_v13 = vpop.eup %896 }
 0x2cf   : > { %v543_v15 = vadd.f32 1.0, %v897_v13 }
 0x2d1   : > { %v544_v16 = vmul.f32 %v543_v15, %v540_v14 }
 0x2d3   : > { %v545_v17 = vadd.f32 %v544_v16, %v1290_v1 }
 0x2d5   : > { %546 = vst [vmem:[%s322_s19] sm:$0xff] %v545_v17 }
 0x2d6   : > { %997 = shalt.err (!%p994_p2)
}
 0x2d7   : > { %s998_s12 = scalar_lea.hbm %s1329_s9, 128  ;;  %s1002_s21 = scalar_lea.hbm %s1380_s7, 256 }
 0x2d8   : > { %p999_p13 = scmp.ne.s32.totalorder %s1329_s9, %s998_s12  ;;  %p1003_p4 = scmp.lt.u32.totalorder %s1329_s9, %s1380_s7 }
 0x2d9   : > { %p1004_p5 = scmp.lt.u32.totalorder %s1002_s21, %s998_s12  ;;  %p1006_p11 = scmp.lt.u32.totalorder %s998_s12, %s1329_s9 }
 0x2da   : > { %p1000_p6 = pnand %p999_p13, %p1394_p0 }
 0x2db   : > { %p1005_p8 = por %p1004_p5, %p1003_p4 }
 0x2dc   : > { %p1001_p10 = pneg %p1000_p6 }
 0x2dd   : > { %p1007_p1 = por %p1006_p11, %p1005_p8 }
 0x2df   : > { %p1008_p3 = pnand %p1007_p1, %p1001_p10 }
 0x2e1   : > { %1011 = shalt.err (!%p1008_p3)
}
 0x2e2   : > { %832 = dma.vmem_to_hbm [thread:$0]  (%p1394_p0), %s1331_s23, 128, %s1329_s9, %s548_s20  }
 0x2e3 PF: > { %s573_s29 = sand.u32 1, %s1042_s24   ;;  %p1395_p7 = scmp.ne.s32.totalorder %s1385_s8, 0 }
 0x2e4   : > { %p1396_p9 = scmp.ge.s32.totalorder %s1054_s27, 2  ;;  %s574_s30 = scalar_lea.sflag [#allocation4], %s573_s29 }
 0x2e6   : > { %p846_p12 = pnand %p1396_p9, %p1395_p7 }
 0x2e8   : > { %1037 = dma.done.wait (!%p846_p12), %s574_s30, 128  }
 0x2e9   : > { %1039 = vsyncadd (!%p846_p12), %s574_s30, 4294967168  ;;  %p21_p2 = scmp.ge.s32.totalorder %s1215_s13, 4   ;;  %s1397_s24 = smov %s1046_s25 }
 0x2ea   : > { %s1398_s25 = smov %s1050_s26  ;;  %s1399_s26 = smov %s1231_s17 }
 0x2eb   : > { %s1400_s27 = smov %s1215_s13  ;;  %23 = sbr.rel (!%p21_p2) target bundleno = 6 (0x6), region = 101 }
 0x2f2   :  { %579 = vsyncpa [#allocation3], 1 }
 0x2f3   :  { %581 = vsyncpa [#allocation3 + $0x1], 1 }
 0x2f4   :  { %582 = vsyncpa [#allocation6], 1 }
 0x2f5   :  { %583 = vsyncpa [#allocation4], 1 }
 0x2f6   :  { %585 = vsyncpa [#allocation4 + $0x1], 1 }

</bundles_post_ra>
